<compile_context>
chip_gen: v6e
topology: v6e:2x2x1
jax: 0.10.0
libtpu: 0.0.40
codegen_flags: <defaults>
</compile_context>

<pallas_src>
import jax
import jax.numpy as jnp
import numpy as np
from jax import lax
from jax.experimental import pallas as pl
from jax.experimental.pallas import tpu as pltpu

# ---------------- model hyper-parameters (small, consistent with the module) ----------------
VOCAB = 32          # vocab_size
E = 32              # embedding_dim
K = 3               # kernel_size (odd -> "same" output length, pad = K//2)
H = 32              # rnn_hidden_size
B = 2               # batch
T = 8               # sequence length
PAD = K // 2
G3 = 3 * H
B_TILE = 8          # sublane-aligned per-grid-step batch tile

# packed-parameter row layout (single lane-dense (P_ROWS, 128) f32 slab, one DMA, resident)
R_WF = 0                      # rows 0:96,   cols 0:96 -> W_fused: K blocks of (VOCAB, 3H)
R_WH = K * VOCAB              # rows 96:128, cols 0:96 -> W_hh^T (H, 3H), gate cols r|z|n
R_BXG = R_WH + H              # row 128,     cols 0:96 -> fused input bias (b_hr/b_hz folded)
R_BHN = R_BXG + 1             # row 129,     cols 0:32 -> b_hn (scaled by r per step)
P_ROWS = ((R_BHN + 1 + 7) // 8) * 8   # 136
P_COLS = 128


def _sigmoid(x):
    # exact: sigmoid(x) = 0.5 * tanh(x / 2) + 0.5  -> single EUP op on the serial chain
    return 0.5 * jnp.tanh(0.5 * x) + 0.5


def _text_embedding_kernel(ids_ref,      # (T*B_TILE, K) int32, pre-shifted ids, -1 = padding
                           params_ref,   # (P_ROWS, 128) f32 packed parameters (resident)
                           out_ref):     # (B_TILE, H)   f32
    f32 = jnp.float32
    BT = B_TILE

    ids = ids_ref[...]                                             # (T*BT, K) int32
    v_iota = lax.broadcasted_iota(jnp.int32, (T * BT, VOCAB), 1)

    # ---- fused embedding + conv taps + GRU input projection: K accumulated matmuls ----
    xg = jnp.zeros((T * BT, G3), f32)
    for k in range(K):                                             # K static -> unrolled
        oh = (ids[:, k:k + 1] == v_iota).astype(f32)               # (T*BT, V); pad id -> zero row
        wk = params_ref[R_WF + k * VOCAB: R_WF + (k + 1) * VOCAB, 0:G3]
        xg = xg + jnp.dot(oh, wk, preferred_element_type=f32)
    xg = xg + params_ref[R_BXG:R_BXG + 1, 0:G3]                    # (T*BT, 3H)

    # per-gate slabs sliced once (off the recurrence chain)
    xg_r = xg[:, 0:H]
    xg_z = xg[:, H:2 * H]
    xg_n = xg[:, 2 * H:3 * H]

    # hoisted recurrent weights: ONE (H, 3H) matrix -> one MXU pass per step
    whh = params_ref[R_WH:R_WH + H, 0:G3]                          # (H, 3H)
    bhn = params_ref[R_BHN:R_BHN + 1, 0:H]                         # (1, H)

    # ---- GRU recurrence, fully unrolled; t = 0 specialized (h == 0, no recurrent matmul) ----
    r = _sigmoid(xg_r[0:BT, :])
    z = _sigmoid(xg_z[0:BT, :])
    n = jnp.tanh(xg_n[0:BT, :] + r * bhn)
    h = (1.0 - z) * n
    total = h
    for t in range(1, T):                                          # static unroll
        gh = jnp.dot(h, whh, preferred_element_type=f32)           # (BT, 3H): single MXU pass
        r = _sigmoid(xg_r[t * BT:(t + 1) * BT, :] + gh[:, 0:H])
        z = _sigmoid(xg_z[t * BT:(t + 1) * BT, :] + gh[:, H:2 * H])
        n = jnp.tanh(xg_n[t * BT:(t + 1) * BT, :] + r * (gh[:, 2 * H:3 * H] + bhn))
        h = (1.0 - z) * n + z * h
        total = total + h

    # mean over time  (TODO(synk): at large batch, write a lane-dense (B/4,128) slab instead)
    out_ref[...] = (total * (1.0 / T)).astype(out_ref.dtype)


def pack_text_embedding_params(emb, conv_w, conv_b, w_ih, w_hh, b_ih, b_hh):
    """Done ONCE at model init (hoisted out of the per-call path).
       PyTorch layouts: conv_w (E_out, E_in, K), conv_b (E,), w_ih (3H, E),
       w_hh (3H, H), b_ih/b_hh (3H,)."""
    f32 = jnp.float32
    emb = emb.astype(f32)
    wih = w_ih.astype(f32).T                                       # (E, 3H)
    whh = w_hh.astype(f32).T                                       # (H, 3H), columns r|z|n

    # Exact linear-chain fusion: W_k = emb @ conv_w[:,:,k].T @ W_ih.T
    w_fused = jnp.concatenate(
        [emb @ conv_w[:, :, k].astype(f32).T @ wih for k in range(K)], axis=0)   # (K*V, 3H)

    b_ih = b_ih.astype(f32)
    b_hh = b_hh.astype(f32)
    b_xg = conv_b.astype(f32) @ wih + b_ih                         # (3H,)
    b_xg = b_xg.at[0:2 * H].add(b_hh[0:2 * H])                     # fold b_hr, b_hz (exact)
    bhn = b_hh[2 * H:3 * H]                                        # b_hn stays (scaled by r)

    params = jnp.zeros((P_ROWS, P_COLS), f32)
    params = params.at[R_WF:R_WF + K * VOCAB, 0:G3].set(w_fused)
    params = params.at[R_WH:R_WH + H, 0:G3].set(whh)
    params = params.at[R_BXG, 0:G3].set(b_xg)
    params = params.at[R_BHN, 0:H].set(bhn)
    return params


def text_embedding_forward(ids_bt, params):
    """ids_bt: (B, T) int32 token ids; params: slab from pack_text_embedding_params."""
    Bb, Tt = ids_bt.shape
    assert Tt == T
    num_tiles = (Bb + B_TILE - 1) // B_TILE
    Bp = num_tiles * B_TILE

    # pad batch to a multiple of B_TILE with id -1 (one-hot row becomes all-zero)
    ids_p = jnp.full((Bp, T), -1, jnp.int32).at[:Bb, :].set(ids_bt.astype(jnp.int32))
    ids_tm = ids_p.T                                               # (T, Bp) time-major

    # pre-shift per conv tap on the wrapper side (no in-kernel concats)
    cols = []
    for k in range(K):
        d = k - PAD
        if d < 0:
            col = jnp.concatenate(
                [jnp.full((-d, Bp), -1, jnp.int32), ids_tm[:T + d]], axis=0)
        elif d > 0:
            col = jnp.concatenate(
                [ids_tm[d:], jnp.full((d, Bp), -1, jnp.int32)], axis=0)
        else:
            col = ids_tm
        cols.append(col)                                           # each (T, Bp)
    shifted = jnp.stack(cols, axis=-1)                             # (T, Bp, K)
    shifted = shifted.reshape(T, num_tiles, B_TILE, K).transpose(1, 0, 2, 3)
    shifted = shifted.reshape(num_tiles, T * B_TILE, K)            # tile-major, time-major rows

    out = pl.pallas_call(
        _text_embedding_kernel,
        out_shape=jax.ShapeDtypeStruct((num_tiles, B_TILE, H), jnp.float32),
        grid_spec=pltpu.PrefetchScalarGridSpec(
            num_scalar_prefetch=0,
            grid=(num_tiles,),
            in_specs=[
                pl.BlockSpec((None, T * B_TILE, K), lambda g: (g, 0, 0)),
                pl.BlockSpec((P_ROWS, P_COLS), lambda g: (0, 0)),   # resident across tiles
            ],
            out_specs=pl.BlockSpec((None, B_TILE, H), lambda g: (g, 0, 0)),
        ),
        compiler_params=pltpu.CompilerParams(
            dimension_semantics=("parallel",)),                    # v7x: tiles across both TCs
    )(shifted, params)

    return out.reshape(Bp, H)[:Bb, :]


# ---------------- pure-JAX reference (mirrors the PyTorch forward exactly) ----------------
def reference(ids_bt, emb, conv_w, conv_b, w_ih, w_hh, b_ih, b_hh):
    x = emb[ids_bt]                                                # (B, T, E)
    xp = jnp.pad(x, ((0, 0), (PAD, PAD), (0, 0)))
    y = conv_b[None, None, :]
    for k in range(K):
        y = y + jnp.einsum('bte,oe->bto', xp[:, k:k + T, :], conv_w[:, :, k])
    h = jnp.zeros((B, H), jnp.float32)
    hs = []
    for t in range(T):
        g_i = y[:, t, :] @ w_ih.T + b_ih
        g_h = h @ w_hh.T + b_hh
        r = jax.nn.sigmoid(g_i[:, :H] + g_h[:, :H])
        z = jax.nn.sigmoid(g_i[:, H:2 * H] + g_h[:, H:2 * H])
        n = jnp.tanh(g_i[:, 2 * H:] + r * g_h[:, 2 * H:])
        h = (1.0 - z) * n + z * h
        hs.append(h)
    return jnp.stack(hs, axis=1).mean(axis=1)


if __name__ == "__main__":
    key = jax.random.PRNGKey(0)
    k_ids, k_emb, k_cw, k_cb, k_wih, k_whh, k_bih, k_bhh = jax.random.split(key, 8)

    ids = jax.random.randint(k_ids, (B, T), 0, VOCAB, dtype=jnp.int32)
    emb = jax.random.normal(k_emb, (VOCAB, E), jnp.float32) * 0.1
    conv_w = jax.random.normal(k_cw, (E, E, K), jnp.float32) * 0.1    # (out, in, K)
    conv_b = jax.random.normal(k_cb, (E,), jnp.float32) * 0.1
    w_ih = jax.random.normal(k_wih, (3 * H, E), jnp.float32) * 0.1
    w_hh = jax.random.normal(k_whh, (3 * H, H), jnp.float32) * 0.1
    b_ih = jax.random.normal(k_bih, (3 * H,), jnp.float32) * 0.1
    b_hh = jax.random.normal(k_bhh, (3 * H,), jnp.float32) * 0.1

    # parameter fusion / packing: ONCE at init, not per forward call
    params = jax.block_until_ready(
        pack_text_embedding_params(emb, conv_w, conv_b, w_ih, w_hh, b_ih, b_hh))

    fwd = jax.jit(text_embedding_forward)
    out = jax.block_until_ready(fwd(ids, params))

    ref = jax.block_until_ready(
        reference(ids, emb, conv_w, conv_b, w_ih, w_hh, b_ih, b_hh))
    np.testing.assert_allclose(np.asarray(out), np.asarray(ref), rtol=1e-3, atol=1e-3)

    print("KERNEL_OK")
</pallas_src>

<mosaic_0001>
module attributes {stable_mosaic.version = 11 : i64} {
  func.func @_text_embedding_kernel(%arg0: i32, %arg1: memref<1x64x3xi32, #tpu.memory_space<vmem>>, %arg2: memref<136x128xf32, #tpu.memory_space<vmem>>, %arg3: memref<1x8x32xf32, #tpu.memory_space<vmem>>) attributes {dimension_semantics = [#tpu.dimension_semantics<parallel>], iteration_bounds = array<i64: 1>, scalar_prefetch = 0 : i64, scratch_operands = 0 : i64, tpu.core_type = #tpu.core_type<tc>, window_params = [{transform_indices = @transform_0, window_bounds = array<i64: 1, 64, 3>}, {pipeline_mode = #tpu.pipeline_mode<synchronous>, transform_indices = @transform_1, window_bounds = array<i64: 136, 128>}, {transform_indices = @transform_2, window_bounds = array<i64: 1, 8, 32>}]} {
    %c0 = arith.constant 0 : index
    %c0_0 = arith.constant 0 : index
    %c0_1 = arith.constant 0 : index
    %0 = vector.load %arg1[%c0, %c0_0, %c0_1] : memref<1x64x3xi32, #tpu.memory_space<vmem>>, vector<1x64x3xi32>
    %1 = vector.shape_cast %0 : vector<1x64x3xi32> to vector<64x3xi32>
    %2 = tpu.iota {dimensions = array<i32: 1>} : vector<64x32xi32>
    %cst = arith.constant 0.000000e+00 : f32
    %3 = vector.broadcast %cst : f32 to vector<64x96xf32>
    %4 = vector.extract_strided_slice %1 {offsets = [0, 0], sizes = [64, 1], strides = [1, 1]} : vector<64x3xi32> to vector<64x1xi32>
    %5 = vector.broadcast %4 : vector<64x1xi32> to vector<64x32xi32>
    %6 = arith.cmpi eq, %5, %2 : vector<64x32xi32>
    %7 = arith.extui %6 : vector<64x32xi1> to vector<64x32xi32>
    %8 = arith.sitofp %7 : vector<64x32xi32> to vector<64x32xf32>
    %c0_2 = arith.constant 0 : index
    %c0_3 = arith.constant 0 : index
    %9 = vector.load %arg2[%c0_2, %c0_3] : memref<136x128xf32, #tpu.memory_space<vmem>>, vector<32x96xf32>
    %cst_4 = arith.constant dense<0.000000e+00> : vector<64x96xf32>
    %10 = tpu.matmul %8, %9, %cst_4 {dimension_numbers = #tpu.dot_dimension_numbers<[1], [0], [0], [1], [0, 0, 1, 1], [], []>} : vector<64x32xf32>, vector<32x96xf32>, vector<64x96xf32> -> vector<64x96xf32>
    %11 = arith.addf %3, %10 : vector<64x96xf32>
    %12 = vector.extract_strided_slice %1 {offsets = [0, 1], sizes = [64, 1], strides = [1, 1]} : vector<64x3xi32> to vector<64x1xi32>
    %13 = vector.broadcast %12 : vector<64x1xi32> to vector<64x32xi32>
    %14 = arith.cmpi eq, %13, %2 : vector<64x32xi32>
    %15 = arith.extui %14 : vector<64x32xi1> to vector<64x32xi32>
    %16 = arith.sitofp %15 : vector<64x32xi32> to vector<64x32xf32>
    %c32 = arith.constant 32 : index
    %c0_5 = arith.constant 0 : index
    %17 = vector.load %arg2[%c32, %c0_5] : memref<136x128xf32, #tpu.memory_space<vmem>>, vector<32x96xf32>
    %cst_6 = arith.constant dense<0.000000e+00> : vector<64x96xf32>
    %18 = tpu.matmul %16, %17, %cst_6 {dimension_numbers = #tpu.dot_dimension_numbers<[1], [0], [0], [1], [0, 0, 1, 1], [], []>} : vector<64x32xf32>, vector<32x96xf32>, vector<64x96xf32> -> vector<64x96xf32>
    %19 = arith.addf %11, %18 : vector<64x96xf32>
    %20 = vector.extract_strided_slice %1 {offsets = [0, 2], sizes = [64, 1], strides = [1, 1]} : vector<64x3xi32> to vector<64x1xi32>
    %21 = vector.broadcast %20 : vector<64x1xi32> to vector<64x32xi32>
    %22 = arith.cmpi eq, %21, %2 : vector<64x32xi32>
    %23 = arith.extui %22 : vector<64x32xi1> to vector<64x32xi32>
    %24 = arith.sitofp %23 : vector<64x32xi32> to vector<64x32xf32>
    %c64 = arith.constant 64 : index
    %c0_7 = arith.constant 0 : index
    %25 = vector.load %arg2[%c64, %c0_7] : memref<136x128xf32, #tpu.memory_space<vmem>>, vector<32x96xf32>
    %cst_8 = arith.constant dense<0.000000e+00> : vector<64x96xf32>
    %26 = tpu.matmul %24, %25, %cst_8 {dimension_numbers = #tpu.dot_dimension_numbers<[1], [0], [0], [1], [0, 0, 1, 1], [], []>} : vector<64x32xf32>, vector<32x96xf32>, vector<64x96xf32> -> vector<64x96xf32>
    %27 = arith.addf %19, %26 : vector<64x96xf32>
    %c128 = arith.constant 128 : index
    %c0_9 = arith.constant 0 : index
    %28 = vector.load %arg2[%c128, %c0_9] : memref<136x128xf32, #tpu.memory_space<vmem>>, vector<1x96xf32>
    %29 = vector.broadcast %28 : vector<1x96xf32> to vector<64x96xf32>
    %30 = arith.addf %27, %29 : vector<64x96xf32>
    %31 = vector.extract_strided_slice %30 {offsets = [0, 0], sizes = [64, 32], strides = [1, 1]} : vector<64x96xf32> to vector<64x32xf32>
    %32 = vector.extract_strided_slice %30 {offsets = [0, 32], sizes = [64, 32], strides = [1, 1]} : vector<64x96xf32> to vector<64x32xf32>
    %33 = vector.extract_strided_slice %30 {offsets = [0, 64], sizes = [64, 32], strides = [1, 1]} : vector<64x96xf32> to vector<64x32xf32>
    %c96 = arith.constant 96 : index
    %c0_10 = arith.constant 0 : index
    %34 = vector.load %arg2[%c96, %c0_10] : memref<136x128xf32, #tpu.memory_space<vmem>>, vector<32x96xf32>
    %c129 = arith.constant 129 : index
    %c0_11 = arith.constant 0 : index
    %35 = vector.load %arg2[%c129, %c0_11] : memref<136x128xf32, #tpu.memory_space<vmem>>, vector<1x32xf32>
    %36 = vector.extract_strided_slice %31 {offsets = [0, 0], sizes = [8, 32], strides = [1, 1]} : vector<64x32xf32> to vector<8x32xf32>
    %cst_12 = arith.constant 5.000000e-01 : f32
    %37 = vector.broadcast %cst_12 : f32 to vector<8x32xf32>
    %38 = arith.mulf %37, %36 : vector<8x32xf32>
    %39 = math.tanh %38 : vector<8x32xf32>
    %cst_13 = arith.constant 5.000000e-01 : f32
    %40 = vector.broadcast %cst_13 : f32 to vector<8x32xf32>
    %41 = arith.mulf %40, %39 : vector<8x32xf32>
    %cst_14 = arith.constant 5.000000e-01 : f32
    %42 = vector.broadcast %cst_14 : f32 to vector<8x32xf32>
    %43 = arith.addf %41, %42 : vector<8x32xf32>
    %44 = vector.extract_strided_slice %32 {offsets = [0, 0], sizes = [8, 32], strides = [1, 1]} : vector<64x32xf32> to vector<8x32xf32>
    %cst_15 = arith.constant 5.000000e-01 : f32
    %45 = vector.broadcast %cst_15 : f32 to vector<8x32xf32>
    %46 = arith.mulf %45, %44 : vector<8x32xf32>
    %47 = math.tanh %46 : vector<8x32xf32>
    %cst_16 = arith.constant 5.000000e-01 : f32
    %48 = vector.broadcast %cst_16 : f32 to vector<8x32xf32>
    %49 = arith.mulf %48, %47 : vector<8x32xf32>
    %cst_17 = arith.constant 5.000000e-01 : f32
    %50 = vector.broadcast %cst_17 : f32 to vector<8x32xf32>
    %51 = arith.addf %49, %50 : vector<8x32xf32>
    %52 = vector.extract_strided_slice %33 {offsets = [0, 0], sizes = [8, 32], strides = [1, 1]} : vector<64x32xf32> to vector<8x32xf32>
    %53 = vector.broadcast %35 : vector<1x32xf32> to vector<8x32xf32>
    %54 = arith.mulf %43, %53 : vector<8x32xf32>
    %55 = arith.addf %52, %54 : vector<8x32xf32>
    %56 = math.tanh %55 : vector<8x32xf32>
    %cst_18 = arith.constant 1.000000e+00 : f32
    %57 = vector.broadcast %cst_18 : f32 to vector<8x32xf32>
    %58 = arith.subf %57, %51 : vector<8x32xf32>
    %59 = arith.mulf %58, %56 : vector<8x32xf32>
    %cst_19 = arith.constant dense<0.000000e+00> : vector<8x96xf32>
    %60 = tpu.matmul %59, %34, %cst_19 {dimension_numbers = #tpu.dot_dimension_numbers<[1], [0], [0], [1], [0, 0, 1, 1], [], []>} : vector<8x32xf32>, vector<32x96xf32>, vector<8x96xf32> -> vector<8x96xf32>
    %61 = vector.extract_strided_slice %31 {offsets = [8, 0], sizes = [8, 32], strides = [1, 1]} : vector<64x32xf32> to vector<8x32xf32>
    %62 = vector.extract_strided_slice %60 {offsets = [0, 0], sizes = [8, 32], strides = [1, 1]} : vector<8x96xf32> to vector<8x32xf32>
    %63 = arith.addf %61, %62 : vector<8x32xf32>
    %cst_20 = arith.constant 5.000000e-01 : f32
    %64 = vector.broadcast %cst_20 : f32 to vector<8x32xf32>
    %65 = arith.mulf %64, %63 : vector<8x32xf32>
    %66 = math.tanh %65 : vector<8x32xf32>
    %cst_21 = arith.constant 5.000000e-01 : f32
    %67 = vector.broadcast %cst_21 : f32 to vector<8x32xf32>
    %68 = arith.mulf %67, %66 : vector<8x32xf32>
    %cst_22 = arith.constant 5.000000e-01 : f32
    %69 = vector.broadcast %cst_22 : f32 to vector<8x32xf32>
    %70 = arith.addf %68, %69 : vector<8x32xf32>
    %71 = vector.extract_strided_slice %32 {offsets = [8, 0], sizes = [8, 32], strides = [1, 1]} : vector<64x32xf32> to vector<8x32xf32>
    %72 = vector.extract_strided_slice %60 {offsets = [0, 32], sizes = [8, 32], strides = [1, 1]} : vector<8x96xf32> to vector<8x32xf32>
    %73 = arith.addf %71, %72 : vector<8x32xf32>
    %cst_23 = arith.constant 5.000000e-01 : f32
    %74 = vector.broadcast %cst_23 : f32 to vector<8x32xf32>
    %75 = arith.mulf %74, %73 : vector<8x32xf32>
    %76 = math.tanh %75 : vector<8x32xf32>
    %cst_24 = arith.constant 5.000000e-01 : f32
    %77 = vector.broadcast %cst_24 : f32 to vector<8x32xf32>
    %78 = arith.mulf %77, %76 : vector<8x32xf32>
    %cst_25 = arith.constant 5.000000e-01 : f32
    %79 = vector.broadcast %cst_25 : f32 to vector<8x32xf32>
    %80 = arith.addf %78, %79 : vector<8x32xf32>
    %81 = vector.extract_strided_slice %33 {offsets = [8, 0], sizes = [8, 32], strides = [1, 1]} : vector<64x32xf32> to vector<8x32xf32>
    %82 = vector.extract_strided_slice %60 {offsets = [0, 64], sizes = [8, 32], strides = [1, 1]} : vector<8x96xf32> to vector<8x32xf32>
    %83 = vector.broadcast %35 : vector<1x32xf32> to vector<8x32xf32>
    %84 = arith.addf %82, %83 : vector<8x32xf32>
    %85 = arith.mulf %70, %84 : vector<8x32xf32>
    %86 = arith.addf %81, %85 : vector<8x32xf32>
    %87 = math.tanh %86 : vector<8x32xf32>
    %cst_26 = arith.constant 1.000000e+00 : f32
    %88 = vector.broadcast %cst_26 : f32 to vector<8x32xf32>
    %89 = arith.subf %88, %80 : vector<8x32xf32>
    %90 = arith.mulf %89, %87 : vector<8x32xf32>
    %91 = arith.mulf %80, %59 : vector<8x32xf32>
    %92 = arith.addf %90, %91 : vector<8x32xf32>
    %93 = arith.addf %59, %92 : vector<8x32xf32>
    %cst_27 = arith.constant dense<0.000000e+00> : vector<8x96xf32>
    %94 = tpu.matmul %92, %34, %cst_27 {dimension_numbers = #tpu.dot_dimension_numbers<[1], [0], [0], [1], [0, 0, 1, 1], [], []>} : vector<8x32xf32>, vector<32x96xf32>, vector<8x96xf32> -> vector<8x96xf32>
    %95 = vector.extract_strided_slice %31 {offsets = [16, 0], sizes = [8, 32], strides = [1, 1]} : vector<64x32xf32> to vector<8x32xf32>
    %96 = vector.extract_strided_slice %94 {offsets = [0, 0], sizes = [8, 32], strides = [1, 1]} : vector<8x96xf32> to vector<8x32xf32>
    %97 = arith.addf %95, %96 : vector<8x32xf32>
    %cst_28 = arith.constant 5.000000e-01 : f32
    %98 = vector.broadcast %cst_28 : f32 to vector<8x32xf32>
    %99 = arith.mulf %98, %97 : vector<8x32xf32>
    %100 = math.tanh %99 : vector<8x32xf32>
    %cst_29 = arith.constant 5.000000e-01 : f32
    %101 = vector.broadcast %cst_29 : f32 to vector<8x32xf32>
    %102 = arith.mulf %101, %100 : vector<8x32xf32>
    %cst_30 = arith.constant 5.000000e-01 : f32
    %103 = vector.broadcast %cst_30 : f32 to vector<8x32xf32>
    %104 = arith.addf %102, %103 : vector<8x32xf32>
    %105 = vector.extract_strided_slice %32 {offsets = [16, 0], sizes = [8, 32], strides = [1, 1]} : vector<64x32xf32> to vector<8x32xf32>
    %106 = vector.extract_strided_slice %94 {offsets = [0, 32], sizes = [8, 32], strides = [1, 1]} : vector<8x96xf32> to vector<8x32xf32>
    %107 = arith.addf %105, %106 : vector<8x32xf32>
    %cst_31 = arith.constant 5.000000e-01 : f32
    %108 = vector.broadcast %cst_31 : f32 to vector<8x32xf32>
    %109 = arith.mulf %108, %107 : vector<8x32xf32>
    %110 = math.tanh %109 : vector<8x32xf32>
    %cst_32 = arith.constant 5.000000e-01 : f32
    %111 = vector.broadcast %cst_32 : f32 to vector<8x32xf32>
    %112 = arith.mulf %111, %110 : vector<8x32xf32>
    %cst_33 = arith.constant 5.000000e-01 : f32
    %113 = vector.broadcast %cst_33 : f32 to vector<8x32xf32>
    %114 = arith.addf %112, %113 : vector<8x32xf32>
    %115 = vector.extract_strided_slice %33 {offsets = [16, 0], sizes = [8, 32], strides = [1, 1]} : vector<64x32xf32> to vector<8x32xf32>
    %116 = vector.extract_strided_slice %94 {offsets = [0, 64], sizes = [8, 32], strides = [1, 1]} : vector<8x96xf32> to vector<8x32xf32>
    %117 = vector.broadcast %35 : vector<1x32xf32> to vector<8x32xf32>
    %118 = arith.addf %116, %117 : vector<8x32xf32>
    %119 = arith.mulf %104, %118 : vector<8x32xf32>
    %120 = arith.addf %115, %119 : vector<8x32xf32>
    %121 = math.tanh %120 : vector<8x32xf32>
    %cst_34 = arith.constant 1.000000e+00 : f32
    %122 = vector.broadcast %cst_34 : f32 to vector<8x32xf32>
    %123 = arith.subf %122, %114 : vector<8x32xf32>
    %124 = arith.mulf %123, %121 : vector<8x32xf32>
    %125 = arith.mulf %114, %92 : vector<8x32xf32>
    %126 = arith.addf %124, %125 : vector<8x32xf32>
    %127 = arith.addf %93, %126 : vector<8x32xf32>
    %cst_35 = arith.constant dense<0.000000e+00> : vector<8x96xf32>
    %128 = tpu.matmul %126, %34, %cst_35 {dimension_numbers = #tpu.dot_dimension_numbers<[1], [0], [0], [1], [0, 0, 1, 1], [], []>} : vector<8x32xf32>, vector<32x96xf32>, vector<8x96xf32> -> vector<8x96xf32>
    %129 = vector.extract_strided_slice %31 {offsets = [24, 0], sizes = [8, 32], strides = [1, 1]} : vector<64x32xf32> to vector<8x32xf32>
    %130 = vector.extract_strided_slice %128 {offsets = [0, 0], sizes = [8, 32], strides = [1, 1]} : vector<8x96xf32> to vector<8x32xf32>
    %131 = arith.addf %129, %130 : vector<8x32xf32>
    %cst_36 = arith.constant 5.000000e-01 : f32
    %132 = vector.broadcast %cst_36 : f32 to vector<8x32xf32>
    %133 = arith.mulf %132, %131 : vector<8x32xf32>
    %134 = math.tanh %133 : vector<8x32xf32>
    %cst_37 = arith.constant 5.000000e-01 : f32
    %135 = vector.broadcast %cst_37 : f32 to vector<8x32xf32>
    %136 = arith.mulf %135, %134 : vector<8x32xf32>
    %cst_38 = arith.constant 5.000000e-01 : f32
    %137 = vector.broadcast %cst_38 : f32 to vector<8x32xf32>
    %138 = arith.addf %136, %137 : vector<8x32xf32>
    %139 = vector.extract_strided_slice %32 {offsets = [24, 0], sizes = [8, 32], strides = [1, 1]} : vector<64x32xf32> to vector<8x32xf32>
    %140 = vector.extract_strided_slice %128 {offsets = [0, 32], sizes = [8, 32], strides = [1, 1]} : vector<8x96xf32> to vector<8x32xf32>
    %141 = arith.addf %139, %140 : vector<8x32xf32>
    %cst_39 = arith.constant 5.000000e-01 : f32
    %142 = vector.broadcast %cst_39 : f32 to vector<8x32xf32>
    %143 = arith.mulf %142, %141 : vector<8x32xf32>
    %144 = math.tanh %143 : vector<8x32xf32>
    %cst_40 = arith.constant 5.000000e-01 : f32
    %145 = vector.broadcast %cst_40 : f32 to vector<8x32xf32>
    %146 = arith.mulf %145, %144 : vector<8x32xf32>
    %cst_41 = arith.constant 5.000000e-01 : f32
    %147 = vector.broadcast %cst_41 : f32 to vector<8x32xf32>
    %148 = arith.addf %146, %147 : vector<8x32xf32>
    %149 = vector.extract_strided_slice %33 {offsets = [24, 0], sizes = [8, 32], strides = [1, 1]} : vector<64x32xf32> to vector<8x32xf32>
    %150 = vector.extract_strided_slice %128 {offsets = [0, 64], sizes = [8, 32], strides = [1, 1]} : vector<8x96xf32> to vector<8x32xf32>
    %151 = vector.broadcast %35 : vector<1x32xf32> to vector<8x32xf32>
    %152 = arith.addf %150, %151 : vector<8x32xf32>
    %153 = arith.mulf %138, %152 : vector<8x32xf32>
    %154 = arith.addf %149, %153 : vector<8x32xf32>
    %155 = math.tanh %154 : vector<8x32xf32>
    %cst_42 = arith.constant 1.000000e+00 : f32
    %156 = vector.broadcast %cst_42 : f32 to vector<8x32xf32>
    %157 = arith.subf %156, %148 : vector<8x32xf32>
    %158 = arith.mulf %157, %155 : vector<8x32xf32>
    %159 = arith.mulf %148, %126 : vector<8x32xf32>
    %160 = arith.addf %158, %159 : vector<8x32xf32>
    %161 = arith.addf %127, %160 : vector<8x32xf32>
    %cst_43 = arith.constant dense<0.000000e+00> : vector<8x96xf32>
    %162 = tpu.matmul %160, %34, %cst_43 {dimension_numbers = #tpu.dot_dimension_numbers<[1], [0], [0], [1], [0, 0, 1, 1], [], []>} : vector<8x32xf32>, vector<32x96xf32>, vector<8x96xf32> -> vector<8x96xf32>
    %163 = vector.extract_strided_slice %31 {offsets = [32, 0], sizes = [8, 32], strides = [1, 1]} : vector<64x32xf32> to vector<8x32xf32>
    %164 = vector.extract_strided_slice %162 {offsets = [0, 0], sizes = [8, 32], strides = [1, 1]} : vector<8x96xf32> to vector<8x32xf32>
    %165 = arith.addf %163, %164 : vector<8x32xf32>
    %cst_44 = arith.constant 5.000000e-01 : f32
    %166 = vector.broadcast %cst_44 : f32 to vector<8x32xf32>
    %167 = arith.mulf %166, %165 : vector<8x32xf32>
    %168 = math.tanh %167 : vector<8x32xf32>
    %cst_45 = arith.constant 5.000000e-01 : f32
    %169 = vector.broadcast %cst_45 : f32 to vector<8x32xf32>
    %170 = arith.mulf %169, %168 : vector<8x32xf32>
    %cst_46 = arith.constant 5.000000e-01 : f32
    %171 = vector.broadcast %cst_46 : f32 to vector<8x32xf32>
    %172 = arith.addf %170, %171 : vector<8x32xf32>
    %173 = vector.extract_strided_slice %32 {offsets = [32, 0], sizes = [8, 32], strides = [1, 1]} : vector<64x32xf32> to vector<8x32xf32>
    %174 = vector.extract_strided_slice %162 {offsets = [0, 32], sizes = [8, 32], strides = [1, 1]} : vector<8x96xf32> to vector<8x32xf32>
    %175 = arith.addf %173, %174 : vector<8x32xf32>
    %cst_47 = arith.constant 5.000000e-01 : f32
    %176 = vector.broadcast %cst_47 : f32 to vector<8x32xf32>
    %177 = arith.mulf %176, %175 : vector<8x32xf32>
    %178 = math.tanh %177 : vector<8x32xf32>
    %cst_48 = arith.constant 5.000000e-01 : f32
    %179 = vector.broadcast %cst_48 : f32 to vector<8x32xf32>
    %180 = arith.mulf %179, %178 : vector<8x32xf32>
    %cst_49 = arith.constant 5.000000e-01 : f32
    %181 = vector.broadcast %cst_49 : f32 to vector<8x32xf32>
    %182 = arith.addf %180, %181 : vector<8x32xf32>
    %183 = vector.extract_strided_slice %33 {offsets = [32, 0], sizes = [8, 32], strides = [1, 1]} : vector<64x32xf32> to vector<8x32xf32>
    %184 = vector.extract_strided_slice %162 {offsets = [0, 64], sizes = [8, 32], strides = [1, 1]} : vector<8x96xf32> to vector<8x32xf32>
    %185 = vector.broadcast %35 : vector<1x32xf32> to vector<8x32xf32>
    %186 = arith.addf %184, %185 : vector<8x32xf32>
    %187 = arith.mulf %172, %186 : vector<8x32xf32>
    %188 = arith.addf %183, %187 : vector<8x32xf32>
    %189 = math.tanh %188 : vector<8x32xf32>
    %cst_50 = arith.constant 1.000000e+00 : f32
    %190 = vector.broadcast %cst_50 : f32 to vector<8x32xf32>
    %191 = arith.subf %190, %182 : vector<8x32xf32>
    %192 = arith.mulf %191, %189 : vector<8x32xf32>
    %193 = arith.mulf %182, %160 : vector<8x32xf32>
    %194 = arith.addf %192, %193 : vector<8x32xf32>
    %195 = arith.addf %161, %194 : vector<8x32xf32>
    %cst_51 = arith.constant dense<0.000000e+00> : vector<8x96xf32>
    %196 = tpu.matmul %194, %34, %cst_51 {dimension_numbers = #tpu.dot_dimension_numbers<[1], [0], [0], [1], [0, 0, 1, 1], [], []>} : vector<8x32xf32>, vector<32x96xf32>, vector<8x96xf32> -> vector<8x96xf32>
    %197 = vector.extract_strided_slice %31 {offsets = [40, 0], sizes = [8, 32], strides = [1, 1]} : vector<64x32xf32> to vector<8x32xf32>
    %198 = vector.extract_strided_slice %196 {offsets = [0, 0], sizes = [8, 32], strides = [1, 1]} : vector<8x96xf32> to vector<8x32xf32>
    %199 = arith.addf %197, %198 : vector<8x32xf32>
    %cst_52 = arith.constant 5.000000e-01 : f32
    %200 = vector.broadcast %cst_52 : f32 to vector<8x32xf32>
    %201 = arith.mulf %200, %199 : vector<8x32xf32>
    %202 = math.tanh %201 : vector<8x32xf32>
    %cst_53 = arith.constant 5.000000e-01 : f32
    %203 = vector.broadcast %cst_53 : f32 to vector<8x32xf32>
    %204 = arith.mulf %203, %202 : vector<8x32xf32>
    %cst_54 = arith.constant 5.000000e-01 : f32
    %205 = vector.broadcast %cst_54 : f32 to vector<8x32xf32>
    %206 = arith.addf %204, %205 : vector<8x32xf32>
    %207 = vector.extract_strided_slice %32 {offsets = [40, 0], sizes = [8, 32], strides = [1, 1]} : vector<64x32xf32> to vector<8x32xf32>
    %208 = vector.extract_strided_slice %196 {offsets = [0, 32], sizes = [8, 32], strides = [1, 1]} : vector<8x96xf32> to vector<8x32xf32>
    %209 = arith.addf %207, %208 : vector<8x32xf32>
    %cst_55 = arith.constant 5.000000e-01 : f32
    %210 = vector.broadcast %cst_55 : f32 to vector<8x32xf32>
    %211 = arith.mulf %210, %209 : vector<8x32xf32>
    %212 = math.tanh %211 : vector<8x32xf32>
    %cst_56 = arith.constant 5.000000e-01 : f32
    %213 = vector.broadcast %cst_56 : f32 to vector<8x32xf32>
    %214 = arith.mulf %213, %212 : vector<8x32xf32>
    %cst_57 = arith.constant 5.000000e-01 : f32
    %215 = vector.broadcast %cst_57 : f32 to vector<8x32xf32>
    %216 = arith.addf %214, %215 : vector<8x32xf32>
    %217 = vector.extract_strided_slice %33 {offsets = [40, 0], sizes = [8, 32], strides = [1, 1]} : vector<64x32xf32> to vector<8x32xf32>
    %218 = vector.extract_strided_slice %196 {offsets = [0, 64], sizes = [8, 32], strides = [1, 1]} : vector<8x96xf32> to vector<8x32xf32>
    %219 = vector.broadcast %35 : vector<1x32xf32> to vector<8x32xf32>
    %220 = arith.addf %218, %219 : vector<8x32xf32>
    %221 = arith.mulf %206, %220 : vector<8x32xf32>
    %222 = arith.addf %217, %221 : vector<8x32xf32>
    %223 = math.tanh %222 : vector<8x32xf32>
    %cst_58 = arith.constant 1.000000e+00 : f32
    %224 = vector.broadcast %cst_58 : f32 to vector<8x32xf32>
    %225 = arith.subf %224, %216 : vector<8x32xf32>
    %226 = arith.mulf %225, %223 : vector<8x32xf32>
    %227 = arith.mulf %216, %194 : vector<8x32xf32>
    %228 = arith.addf %226, %227 : vector<8x32xf32>
    %229 = arith.addf %195, %228 : vector<8x32xf32>
    %cst_59 = arith.constant dense<0.000000e+00> : vector<8x96xf32>
    %230 = tpu.matmul %228, %34, %cst_59 {dimension_numbers = #tpu.dot_dimension_numbers<[1], [0], [0], [1], [0, 0, 1, 1], [], []>} : vector<8x32xf32>, vector<32x96xf32>, vector<8x96xf32> -> vector<8x96xf32>
    %231 = vector.extract_strided_slice %31 {offsets = [48, 0], sizes = [8, 32], strides = [1, 1]} : vector<64x32xf32> to vector<8x32xf32>
    %232 = vector.extract_strided_slice %230 {offsets = [0, 0], sizes = [8, 32], strides = [1, 1]} : vector<8x96xf32> to vector<8x32xf32>
    %233 = arith.addf %231, %232 : vector<8x32xf32>
    %cst_60 = arith.constant 5.000000e-01 : f32
    %234 = vector.broadcast %cst_60 : f32 to vector<8x32xf32>
    %235 = arith.mulf %234, %233 : vector<8x32xf32>
    %236 = math.tanh %235 : vector<8x32xf32>
    %cst_61 = arith.constant 5.000000e-01 : f32
    %237 = vector.broadcast %cst_61 : f32 to vector<8x32xf32>
    %238 = arith.mulf %237, %236 : vector<8x32xf32>
    %cst_62 = arith.constant 5.000000e-01 : f32
    %239 = vector.broadcast %cst_62 : f32 to vector<8x32xf32>
    %240 = arith.addf %238, %239 : vector<8x32xf32>
    %241 = vector.extract_strided_slice %32 {offsets = [48, 0], sizes = [8, 32], strides = [1, 1]} : vector<64x32xf32> to vector<8x32xf32>
    %242 = vector.extract_strided_slice %230 {offsets = [0, 32], sizes = [8, 32], strides = [1, 1]} : vector<8x96xf32> to vector<8x32xf32>
    %243 = arith.addf %241, %242 : vector<8x32xf32>
    %cst_63 = arith.constant 5.000000e-01 : f32
    %244 = vector.broadcast %cst_63 : f32 to vector<8x32xf32>
    %245 = arith.mulf %244, %243 : vector<8x32xf32>
    %246 = math.tanh %245 : vector<8x32xf32>
    %cst_64 = arith.constant 5.000000e-01 : f32
    %247 = vector.broadcast %cst_64 : f32 to vector<8x32xf32>
    %248 = arith.mulf %247, %246 : vector<8x32xf32>
    %cst_65 = arith.constant 5.000000e-01 : f32
    %249 = vector.broadcast %cst_65 : f32 to vector<8x32xf32>
    %250 = arith.addf %248, %249 : vector<8x32xf32>
    %251 = vector.extract_strided_slice %33 {offsets = [48, 0], sizes = [8, 32], strides = [1, 1]} : vector<64x32xf32> to vector<8x32xf32>
    %252 = vector.extract_strided_slice %230 {offsets = [0, 64], sizes = [8, 32], strides = [1, 1]} : vector<8x96xf32> to vector<8x32xf32>
    %253 = vector.broadcast %35 : vector<1x32xf32> to vector<8x32xf32>
    %254 = arith.addf %252, %253 : vector<8x32xf32>
    %255 = arith.mulf %240, %254 : vector<8x32xf32>
    %256 = arith.addf %251, %255 : vector<8x32xf32>
    %257 = math.tanh %256 : vector<8x32xf32>
    %cst_66 = arith.constant 1.000000e+00 : f32
    %258 = vector.broadcast %cst_66 : f32 to vector<8x32xf32>
    %259 = arith.subf %258, %250 : vector<8x32xf32>
    %260 = arith.mulf %259, %257 : vector<8x32xf32>
    %261 = arith.mulf %250, %228 : vector<8x32xf32>
    %262 = arith.addf %260, %261 : vector<8x32xf32>
    %263 = arith.addf %229, %262 : vector<8x32xf32>
    %cst_67 = arith.constant dense<0.000000e+00> : vector<8x96xf32>
    %264 = tpu.matmul %262, %34, %cst_67 {dimension_numbers = #tpu.dot_dimension_numbers<[1], [0], [0], [1], [0, 0, 1, 1], [], []>} : vector<8x32xf32>, vector<32x96xf32>, vector<8x96xf32> -> vector<8x96xf32>
    %265 = vector.extract_strided_slice %31 {offsets = [56, 0], sizes = [8, 32], strides = [1, 1]} : vector<64x32xf32> to vector<8x32xf32>
    %266 = vector.extract_strided_slice %264 {offsets = [0, 0], sizes = [8, 32], strides = [1, 1]} : vector<8x96xf32> to vector<8x32xf32>
    %267 = arith.addf %265, %266 : vector<8x32xf32>
    %cst_68 = arith.constant 5.000000e-01 : f32
    %268 = vector.broadcast %cst_68 : f32 to vector<8x32xf32>
    %269 = arith.mulf %268, %267 : vector<8x32xf32>
    %270 = math.tanh %269 : vector<8x32xf32>
    %cst_69 = arith.constant 5.000000e-01 : f32
    %271 = vector.broadcast %cst_69 : f32 to vector<8x32xf32>
    %272 = arith.mulf %271, %270 : vector<8x32xf32>
    %cst_70 = arith.constant 5.000000e-01 : f32
    %273 = vector.broadcast %cst_70 : f32 to vector<8x32xf32>
    %274 = arith.addf %272, %273 : vector<8x32xf32>
    %275 = vector.extract_strided_slice %32 {offsets = [56, 0], sizes = [8, 32], strides = [1, 1]} : vector<64x32xf32> to vector<8x32xf32>
    %276 = vector.extract_strided_slice %264 {offsets = [0, 32], sizes = [8, 32], strides = [1, 1]} : vector<8x96xf32> to vector<8x32xf32>
    %277 = arith.addf %275, %276 : vector<8x32xf32>
    %cst_71 = arith.constant 5.000000e-01 : f32
    %278 = vector.broadcast %cst_71 : f32 to vector<8x32xf32>
    %279 = arith.mulf %278, %277 : vector<8x32xf32>
    %280 = math.tanh %279 : vector<8x32xf32>
    %cst_72 = arith.constant 5.000000e-01 : f32
    %281 = vector.broadcast %cst_72 : f32 to vector<8x32xf32>
    %282 = arith.mulf %281, %280 : vector<8x32xf32>
    %cst_73 = arith.constant 5.000000e-01 : f32
    %283 = vector.broadcast %cst_73 : f32 to vector<8x32xf32>
    %284 = arith.addf %282, %283 : vector<8x32xf32>
    %285 = vector.extract_strided_slice %33 {offsets = [56, 0], sizes = [8, 32], strides = [1, 1]} : vector<64x32xf32> to vector<8x32xf32>
    %286 = vector.extract_strided_slice %264 {offsets = [0, 64], sizes = [8, 32], strides = [1, 1]} : vector<8x96xf32> to vector<8x32xf32>
    %287 = vector.broadcast %35 : vector<1x32xf32> to vector<8x32xf32>
    %288 = arith.addf %286, %287 : vector<8x32xf32>
    %289 = arith.mulf %274, %288 : vector<8x32xf32>
    %290 = arith.addf %285, %289 : vector<8x32xf32>
    %291 = math.tanh %290 : vector<8x32xf32>
    %cst_74 = arith.constant 1.000000e+00 : f32
    %292 = vector.broadcast %cst_74 : f32 to vector<8x32xf32>
    %293 = arith.subf %292, %284 : vector<8x32xf32>
    %294 = arith.mulf %293, %291 : vector<8x32xf32>
    %295 = arith.mulf %284, %262 : vector<8x32xf32>
    %296 = arith.addf %294, %295 : vector<8x32xf32>
    %297 = arith.addf %263, %296 : vector<8x32xf32>
    %cst_75 = arith.constant 1.250000e-01 : f32
    %298 = vector.broadcast %cst_75 : f32 to vector<8x32xf32>
    %299 = arith.mulf %297, %298 : vector<8x32xf32>
    %c0_76 = arith.constant 0 : index
    %c0_77 = arith.constant 0 : index
    %c0_78 = arith.constant 0 : index
    %300 = vector.load %arg3[%c0_76, %c0_77, %c0_78] : memref<1x8x32xf32, #tpu.memory_space<vmem>>, vector<1x8x32xf32>
    %301 = vector.shape_cast %300 : vector<1x8x32xf32> to vector<8x32xf32>
    %302 = vector.shape_cast %299 : vector<8x32xf32> to vector<1x8x32xf32>
    tpu.vector_store %arg3[%c0_76, %c0_77, %c0_78], %302 {strides = array<i32>} : memref<1x8x32xf32, #tpu.memory_space<vmem>>, vector<1x8x32xf32>,
    return
  }
  func.func @transform_0(%arg0: i32) -> (i32, i32, i32) {
    %c0_i32 = arith.constant 0 : i32
    %c0_i32_0 = arith.constant 0 : i32
    %c0_i32_1 = arith.constant 0 : i32
    return %arg0, %c0_i32, %c0_i32_0 : i32, i32, i32
  }
  func.func @transform_1(%arg0: i32) -> (i32, i32) {
    %c0_i32 = arith.constant 0 : i32
    %c0_i32_0 = arith.constant 0 : i32
    %c0_i32_1 = arith.constant 0 : i32
    return %c0_i32, %c0_i32_0 : i32, i32
  }
  func.func @transform_2(%arg0: i32) -> (i32, i32, i32) {
    %c0_i32 = arith.constant 0 : i32
    %c0_i32_0 = arith.constant 0 : i32
    %c0_i32_1 = arith.constant 0 : i32
    return %arg0, %c0_i32, %c0_i32_0 : i32, i32, i32
  }
}

</mosaic_0001>

<bundles_post_ra>
// kernel: text_embedding_forward.1
= control target key start
LH: loop header
LB: loop body
LE: loop exit
PB: predicated region body
PF: predicated region fallthrough
CT: control target
= control target key end

     0   :  { %v1647_v0 = vmov 1   ;;  %v1648_v18 = vmov 0   ;;  %v1649_v19 = vmov 0.0   ;;  %v1650_v20 = vmov 2   ;;  %s1651_s22 = smov 64   ;;  %s1652_s25 = smov 96   ;;  %s2065_s0 = inlined_call_operand.vmem [shape: s32[1,64,3], index: 0, kind: input, shape index: {}]   ;;  %s2066_s1 = inlined_call_operand.vmem [shape: f32[136,128], index: 1, kind: input, shape index: {}]   ;;  %s2067_s2 = inlined_call_operand.vmem [shape: f32[1,8,32], index: 2, kind: output, shape index: {}]  }
   0x1   :  { %1606 = vset.pattern.permute.xlu1 %v1647_v0  ;;  %1605 = vset.pattern.permute.xlu0 %v1647_v0  ;;  %v1672_v1 = vld [vmem:[%s2065_s0 + $0x10] sm:$0xff]  ;;  %v11_v2 = vld [vmem:[%s2065_s0] sm:$0xff]  ;;  %v1681_v3 = vld [vmem:[%s2065_s0 + $0x18] sm:$0xff]  ;;  %v19_v21 = vlaneseq  ;;  %vm125_vm0 = vcmask 261120  }
   0x2   :  { %80 = vperm.xlu1 %1606, %v1672_v1   ;;  %74 = vperm.xlu0 %1605, %v11_v2   ;;  %v12_v4 = vld [vmem:[%s2065_s0 + $0x8] sm:$0xff]  ;;  %v124_v5 = vld [vmem:[%s2066_s1 + $0x38] sm:$0xff]  ;;  %v123_v6 = vld [vmem:[%s2066_s1 + $0x30] sm:$0xff] }
   0x3   :  { %1461 = vmatprep.subr.mxu0 %v124_v5  ;;  %v122_v7 = vld [vmem:[%s2066_s1 + $0x28] sm:$0xff]  ;;  %v1704_v9 = vld [vmem:[%s2065_s0 + $0x20] sm:$0xff]  ;;  %v72_v11 = vld [vmem:[%s2066_s1 + $0x18] sm:$0xff]  ;;  %v1745_v22 = vand.u32 127, %v19_v21 }
   0x4   :  { %1462 = vmatpush3.msra.mxu0 %v124_v5  ;;  %v1699_v8 = vld [vmem:[%s2065_s0 + $0x28] sm:$0xff]  ;;  %v121_v10 = vld [vmem:[%s2066_s1 + $0x20] sm:$0xff]  ;;  %v1717_v12 = vld [vmem:[%s2065_s0 + $0x38] sm:$0xff]  ;;  %1481 = vmatprep.subr.mxu1 %v72_v11 }
   0x5   :  { %1463 = vmatprep.subr.mxu0 %v123_v6  ;;  %v1722_v13 = vld [vmem:[%s2065_s0 + $0x30] sm:$0xff]  ;;  %v435_v15 = vld [vmem:[%s2066_s1 + $0x58] sm:$0xff]  ;;  %1482 = vmatpush3.msra.mxu1 %v72_v11  ;;  %v70_v16 = vld [vmem:[%s2066_s1 + $0x8] sm:$0xff] }
   0x6   :  { %83 = vperm.xlu1 %1606, %v1681_v3   ;;  %77 = vperm.xlu0 %1605, %v12_v4   ;;  %v71_v14 = vld [vmem:[%s2066_s1 + $0x10] sm:$0xff]  ;;  %v69_v17 = vld [vmem:[%s2066_s1] sm:$0xff]  ;;  %v433_v33 = vld [vmem:[%s2066_s1 + $0x48] sm:$0xff] }
   0x7   :  { %1464 = vmatpush3.msra.mxu0 %v123_v6  ;;  %1483 = vmatprep.subr.mxu1 %v71_v14  ;;  %v434_v29 = vld [vmem:[%s2066_s1 + $0x50] sm:$0xff]  ;;  %v432_v36 = vld [vmem:[%s2066_s1 + $0x40] sm:$0xff] }
   0x8   :  { %1465 = vmatprep.subr.mxu0 %v122_v7  ;;  %1484 = vmatpush3.msra.mxu1 %v71_v14  ;;  %v1382_v50 = vld [vmem:[%s2066_s1 + $0x81] ss:$0 sm:$0xff]  ;;  %v1814_v5 = vld [vmem:[%s2066_s1 + $0x80] ss:$0 sm:$0xff] }
   0x9   :  { %1466 = vmatpush3.msra.mxu0 %v122_v7  ;;  %1485 = vmatprep.subr.mxu1 %v70_v16 }
   0xa   :  { %89 = vperm.xlu1 %1606, %v1699_v8   ;;  %86 = vperm.xlu0 %1605, %v1704_v9  }
   0xb   :  { %1467 = vmatprep.subr.mxu0 %v121_v10  ;;  %1486 = vmatpush3.msra.mxu1 %v70_v16 }
   0xc   :  { %1468 = vmatpush3.msra.mxu0 %v121_v10  ;;  %1487 = vmatprep.subr.mxu1 %v69_v17 }
   0xd   :  { %1501 = vmatprep.subr.mxu0 %v435_v15  ;;  %1488 = vmatpush3.msra.mxu1 %v69_v17 }
   0xe   :  { %95 = vperm.xlu1 %1606, %v1717_v12   ;;  %92 = vperm.xlu0 %1605, %v1722_v13  }
   0xf   :  { %1521 = vmatprep.subr.mxu1 %v1649_v19 }
  0x12   :  { %1608 = vset.pattern.permute.xlu1 %v1648_v18  ;;  %1607 = vset.pattern.permute.xlu0 %v1648_v18 }
  0x13   :  { %25 = vperm.xlu1 %1608, %v12_v4   ;;  %22 = vperm.xlu0 %1607, %v11_v2  }
  0x17   :  { %1609 = vset.pattern.permute.xlu1 %v1650_v20  ;;  %1610 = vset.pattern.permute.xlu0 %v1650_v20 }
  0x18   :  { %385 = vperm.xlu1 %1609, %v11_v2   ;;  %388 = vperm.xlu0 %1610, %v12_v4  }
  0x1c   :  { %1611 = vset.pattern.permute.xlu0 %v1648_v18  ;;  %1612 = vset.pattern.permute.xlu1 %v1648_v18 }
  0x1d   :  { %28 = vperm.xlu0 %1611, %v1672_v1  }
  0x21   :  { %37 = vperm.xlu0 %1611, %v1699_v8  }
  0x25   :  { %43 = vperm.xlu0 %1611, %v1717_v12  }
  0x29   :  { %1614 = vset.pattern.permute.xlu0 %v1650_v20 }
  0x2a   :  { %693 = vrot.lane.b32.xlu0 %v1382_v50, %s1651_s22 }
  0x7d   :  { %v81_v23 = vpop.permute.xlu1 %80  ;;  %v75_v24 = vpop.permute.xlu0 %74 }
  0x7e   :  { %vm97_vm1 = vcmp.eq.s32.totalorder %v75_v24, %v1745_v22  ;;  %vm99_vm2 = vcmp.eq.s32.totalorder %v81_v23, %v1745_v22  ;;  %v1827_v24 = vld [vmem:[%s2066_s1 + $0x78] sm:$0xff] }
  0x7f   :  { %v1341_v25 = vsel %vm97_vm1, 1.0, %v1649_v19  ;;  %v1343_v30 = vsel %vm99_vm2, 1.0, %v1649_v19 }
  0x80   :  { %1469 = vmatprep.mubr.msk.f32.mxu0 %vm125_vm0, %v1341_v25  ;;  %v1832_v25 = vld [vmem:[%s2066_s1 + $0x70] sm:$0xff] }
  0x81   :  { %v84_v26 = vpop.permute.xlu1 %83  ;;  %v78_v27 = vpop.permute.xlu0 %77 }
  0x82   :  { %vm98_vm3 = vcmp.eq.s32.totalorder %v78_v27, %v1745_v22  ;;  %vm100_vm4 = vcmp.eq.s32.totalorder %v84_v26, %v1745_v22  ;;  %v1840_v26 = vld [vmem:[%s2066_s1 + $0x68] sm:$0xff]  ;;  %v1849_v27 = vld [vmem:[%s2066_s1 + $0x60] sm:$0xff] }
  0x83   :  { %v1342_v28 = vsel %vm98_vm3, 1.0, %v1649_v19  ;;  %v1344_v34 = vsel %vm100_vm4, 1.0, %v1649_v19  ;;  %vm1653_vm4 = vmmov 0  }
  0x84   :  { %1470 = vmatmul.mubr.msk.f32.vlgmr.msra.gmra.mxu0 %vm125_vm0, %v1342_v28 }
  0x85   :  { %v90_v31 = vpop.permute.xlu1 %89  ;;  %1472 = vmatprep.mubr.msk.f32.mxu0 %vm125_vm0, %v1343_v30  ;;  %v87_v32 = vpop.permute.xlu0 %86  ;;  %1502 = vmatpush3.msra.mxu0 %v435_v15 }
  0x86   :  { %vm101_vm5 = vcmp.eq.s32.totalorder %v87_v32, %v1745_v22  ;;  %1503 = vmatprep.subr.mxu0 %v434_v29  ;;  %vm102_vm6 = vcmp.eq.s32.totalorder %v90_v31, %v1745_v22 }
  0x87   :  { %v1345_v35 = vsel %vm101_vm5, 1.0, %v1649_v19  ;;  %1504 = vmatpush3.msra.mxu0 %v434_v29  ;;  %v1346_v39 = vsel %vm102_vm6, 1.0, %v1649_v19 }
  0x88   :  { %1473 = vmatmul.mubr.msk.f32.gmra.mxu0 %vm125_vm0, %v1344_v34  ;;  %1505 = vmatprep.subr.mxu0 %v433_v33 }
  0x89   :  { %v96_v37 = vpop.permute.xlu1 %95  ;;  %1475 = vmatprep.mubr.msk.f32.mxu0 %vm125_vm0, %v1345_v35  ;;  %v93_v38 = vpop.permute.xlu0 %92  ;;  %1506 = vmatpush3.msra.mxu0 %v433_v33 }
  0x8a   :  { %vm103_vm7 = vcmp.eq.s32.totalorder %v93_v38, %v1745_v22  ;;  %1507 = vmatprep.subr.mxu0 %v432_v36  ;;  %vm104_vm8 = vcmp.eq.s32.totalorder %v96_v37, %v1745_v22 }
  0x8b   :  { %v1347_v40 = vsel %vm103_vm7, 1.0, %v1649_v19  ;;  %1508 = vmatpush3.msra.mxu0 %v432_v36  ;;  %v1348_v43 = vsel %vm104_vm8, 1.0, %v1649_v19 }
  0x8c   :  { %1476 = vmatmul.mubr.msk.f32.gmra.mxu0 %vm125_vm0, %v1346_v39  ;;  %1543 = vmatprep.subr.mxu0 %v1649_v19 }
  0x8d   :  { %1478 = vmatprep.mubr.msk.f32.mxu0 %vm125_vm0, %v1347_v40 }
  0x8e   :  { %v26_v41 = vpop.permute.xlu1 %25  ;;  %v23_v42 = vpop.permute.xlu0 %22 }
  0x8f   :  { %vm46_vm9 = vcmp.eq.s32.totalorder %v26_v41, %v1745_v22  ;;  %vm45_vm10 = vcmp.eq.s32.totalorder %v23_v42, %v1745_v22 }
  0x90   :  { %v1334_v44 = vsel %vm46_vm9, 1.0, %v1649_v19  ;;  %1479 = vmatmul.mubr.msk.f32.gmra.mxu0 %vm125_vm0, %v1348_v43  ;;  %v1333_v45 = vsel %vm45_vm10, 1.0, %v1649_v19 }
  0x91   :  { %1489 = vmatprep.mubr.msk.f32.mxu1 %vm125_vm0, %v1333_v45 }
  0x92   :  { %1490 = vmatmul.mubr.msk.f32.vlgmr.msra.gmra.mxu1 %vm125_vm0, %v1334_v44 }
  0x93   :  { %v386_v46 = vpop.permute.xlu1 %385  ;;  %v389_v47 = vpop.permute.xlu0 %388  ;;  %1522 = vmatpush3.msra.mxu1 %v1827_v24 }
  0x94   :  { %vm408_vm11 = vcmp.eq.s32.totalorder %v386_v46, %v1745_v22  ;;  %vm409_vm12 = vcmp.eq.s32.totalorder %v389_v47, %v1745_v22  ;;  %1523 = vmatprep.subr.mxu1 %v1649_v19 }
  0x95   :  { %v1365_v48 = vsel %vm408_vm11, 1.0, %v1649_v19  ;;  %v1366_v49 = vsel %vm409_vm12, 1.0, %v1649_v19  ;;  %1524 = vmatpush3.msra.mxu1 %v1832_v25 }
  0x96   :  { %1509 = vmatprep.mubr.msk.f32.mxu0 %vm125_vm0, %v1365_v48  ;;  %1525 = vmatprep.subr.mxu1 %v1649_v19 }
  0x97   :  { %1510 = vmatmul.mubr.msk.f32.vlgmr.msra.gmra.mxu0 %vm125_vm0, %v1366_v49  ;;  %1526 = vmatpush3.msra.mxu1 %v1840_v26 }
  0x98   :  { %v29_v18 = vpop.permute.xlu0 %28  ;;  %1544 = vmatpush3.msra.mxu0 %v1827_v24  ;;  %1527 = vmatprep.subr.mxu1 %v1649_v19 }
  0x99   :  { %vm47_vm13 = vcmp.eq.s32.totalorder %v29_v18, %v1745_v22  ;;  %1545 = vmatprep.subr.mxu0 %v1649_v19  ;;  %1528 = vmatpush3.msra.mxu1 %v1849_v27 }
  0x9a   :  { %v1335_v21 = vsel %vm47_vm13, 1.0, %v1649_v19  ;;  %1546 = vmatpush3.msra.mxu0 %v1832_v25  ;;  %1532 = vmatprep.subr.mxu1 %v1649_v19 }
  0x9b   :  { %1492 = vmatprep.mubr.msk.f32.mxu1 %vm125_vm0, %v1335_v21  ;;  %1547 = vmatprep.subr.mxu0 %v1649_v19 }
  0x9c   :  { %1548 = vmatpush3.msra.mxu0 %v1840_v26 }
  0x9d   :  { %1549 = vmatprep.subr.mxu0 %v1649_v19 }
  0x9e   :  { %1550 = vmatpush3.msra.mxu0 %v1849_v27 }
  0x9f   :  { %1565 = vmatprep.subr.mxu0 %v1649_v19 }
 0x144   :  { %v1471_v51 = vpop.f32.mrf.mxu0 }
 0x146   :  { %v216_v52 = vpop.f32.mrf.mxu0 }
 0x148   :  { %v1797_v53 = vpop.f32.mrf.mxu0 }
 0x14a   :  { %v1799_v54 = vpop.f32.mrf.mxu0 }
 0x14c   :  { %v1801_v55 = vpop.f32.mrf.mxu0 }
 0x14e   :  { %v1803_v56 = vpop.f32.mrf.mxu0 }
 0x150   :  { %v1805_v57 = vpop.f32.mrf.mxu0 }
 0x152   :  { %v1491_v58 = vpop.f32.mrf.mxu1  ;;  %v1807_v60 = vpop.f32.mrf.mxu0 }
 0x153   :  { %v351_v59 = vadd.f32 %v1491_v58, %v1471_v51 }
 0x154   :  { %v345_v61 = vpop.f32.mrf.mxu1 }
 0x155   :  { %v346_v63 = vadd.f32 %v345_v61, %v216_v52 }
 0x157   :  { %v1511_v62 = vpop.f32.mrf.mxu0 }
 0x158   :  { %v1809_v0 = vadd.f32 %v1511_v62, %v351_v59 }
 0x159   :  { %v526_v2 = vpop.f32.mrf.mxu0 }
 0x15a   :  { %v565_v4 = vadd.f32 %v526_v2, %v346_v63  ;;  %v579_v51 = vadd.f32 %v1814_v5, %v1809_v0 }
 0x15c   :  { %v578_v6 = vadd.f32 %v1814_v5, %v565_v4 }
 0x15e   :  { %v591_v7 = vmul.f32 0.5, %v578_v6 }
 0x160   :  { %1615 = vtanh.f32 %v591_v7 }
 0x16d   :  { %v1616_v10 = vpop.eup %1615 }
 0x16e   :  { %v593_v11 = vmul.f32 0.5, %v1616_v10 }
 0x170   :  { %v594_v14 = vadd.f32 0.5, %v593_v11 }
 0x172   :  { %v599_v15 = vmul.f32 %v1382_v50, %v594_v14  ;;  %v606_v28 = vsub.f32 1.0, %v594_v14 }
 0x174   :  { %601 = vrot.lane.b32.xlu1 %v599_v15, %s1651_s22 }
 0x1e6   :  { %v602_v16 = vpop.permute.xlu1 %601 }
 0x1e7   :  { %v604_v17 = vadd.f32 %v602_v16, %v578_v6 }
 0x1e9   :  { %1617 = vtanh.f32 %v604_v17 }
 0x1f6   :  { %v1618_v23 = vpop.eup %1617 }
 0x1f7   :  { %608 = vrot.lane.b32.xlu1 %v1618_v23, %s1652_s25 }
 0x1fb   :  { %31 = vperm.xlu1 %1612, %v1681_v3  }
 0x1ff   :  { %34 = vperm.xlu1 %1612, %v1704_v9  }
 0x203   :  { %40 = vperm.xlu1 %1612, %v1722_v13  }
 0x207   :  { %1613 = vset.pattern.permute.xlu1 %v1650_v20  ;;  %v38_v20 = vpop.permute.xlu0 %37 }
 0x208   :  { %vm50_vm15 = vcmp.eq.s32.totalorder %v38_v20, %v1745_v22 }
 0x209   :  { %v1338_v35 = vsel %vm50_vm15, 1.0, %v1649_v19 }
 0x20b   :  { %v44_v33 = vpop.permute.xlu0 %43 }
 0x20c   :  { %vm52_vm2 = vcmp.eq.s32.totalorder %v44_v33, %v1745_v22 }
 0x20d   :  { %v1340_v38 = vsel %vm52_vm2, 1.0, %v1649_v19 }
 0x20f   :  { %v1902_v47 = vpop.permute.xlu0 %693 }
 0x269   :  { %v609_v29 = vpop.permute.xlu1 %608 }
 0x26a   :  { %v1862_v30 = vmul.f32 %v609_v29, %v606_v28 }
 0x26c   :  { %613 = vrot.lane.b32.xlu1 %v1862_v30, %s1652_s25 }
 0x276   :  { %v32_v31 = vpop.permute.xlu1 %31 }
 0x277   :  { %vm48_vm14 = vcmp.eq.s32.totalorder %v32_v31, %v1745_v22 }
 0x278   :  { %v1336_v32 = vsel %vm48_vm14, 1.0, %v1649_v19 }
 0x279   :  { %1493 = vmatmul.mubr.msk.f32.gmra.mxu1 %vm125_vm0, %v1336_v32 }
 0x27a   :  { %v35_v34 = vpop.permute.xlu1 %34 }
 0x27b   :  { %vm49_vm1 = vcmp.eq.s32.totalorder %v35_v34, %v1745_v22 }
 0x27c   :  { %v1337_v36 = vsel %vm49_vm1, 1.0, %v1649_v19 }
 0x27d   :  { %1495 = vmatprep.mubr.msk.f32.mxu1 %vm125_vm0, %v1337_v36 }
 0x27e   :  { %v41_v37 = vpop.permute.xlu1 %40  ;;  %1496 = vmatmul.mubr.msk.f32.gmra.mxu1 %vm125_vm0, %v1338_v35 }
 0x27f   :  { %vm51_vm3 = vcmp.eq.s32.totalorder %v41_v37, %v1745_v22 }
 0x280   :  { %v1339_v39 = vsel %vm51_vm3, 1.0, %v1649_v19 }
 0x281   :  { %1498 = vmatprep.mubr.msk.f32.mxu1 %vm125_vm0, %v1339_v39 }
 0x282   :  { %1499 = vmatmul.mubr.msk.f32.gmra.mxu1 %vm125_vm0, %v1340_v38 }
 0x283   :  { %1529 = vmatprep.mubr.msk.f32.mxu1 %vm1653_vm4, %v1649_v19 }
 0x2de   :  { %v614_v40 = vpop.permute.xlu1 %613 }
 0x2df   :  { %1530 = vmatmul.mubr.msk.f32.vlgmr.msra.gmra.mxu1 %vm125_vm0, %v614_v40 }
 0x2e0   :  { %1533 = vmatpush3.msra.mxu1 %v1827_v24  ;;  %1540 = vmatprep.mubr.msk.f32.mxu1 %vm1653_vm4, %v1649_v19 }
 0x2e1   :  { %1534 = vmatprep.subr.mxu1 %v1649_v19 }
 0x2e2   :  { %1535 = vmatpush3.msra.mxu1 %v1832_v25 }
 0x2e3   :  { %1536 = vmatprep.subr.mxu1 %v1649_v19 }
 0x2e4   :  { %1537 = vmatpush3.msra.mxu1 %v1840_v26 }
 0x2e5   :  { %1538 = vmatprep.subr.mxu1 %v1649_v19 }
 0x2e6   :  { %1539 = vmatpush3.msra.mxu1 %v1849_v27 }
 0x2e7   :  { %1554 = vmatprep.subr.mxu1 %v1649_v19 }
 0x339   :  { %v1494_v41 = vpop.f32.mrf.mxu1 }
 0x33a   :  { %v361_v29 = vadd.f32 %v1494_v41, %v1797_v53 }
 0x33b   :  { %v355_v42 = vpop.f32.mrf.mxu1 }
 0x33c   :  { %v356_v33 = vadd.f32 %v355_v42, %v1799_v54 }
 0x33e   :  { %v1894_v43 = vpop.f32.mrf.mxu1 }
 0x340   :  { %v1896_v44 = vpop.f32.mrf.mxu1 }
 0x342   :  { %v1898_v45 = vpop.f32.mrf.mxu1 }
 0x344   :  { %v1900_v46 = vpop.f32.mrf.mxu1 }
 0x39f   :  { %v683_v48 = vpop.f32.mrf.mxu1 }
 0x3a0   :  { %v696_v49 = vadd.f32 %v1902_v47, %v683_v48  ;;  %v687_v52 = vadd.f32 %v683_v48, %v579_v51 }
 0x3a1   :  { %v1531_v50 = vpop.f32.mrf.mxu1 }
 0x3a2   :  { %698 = vrot.lane.b32.xlu1 %v696_v49, %s1651_s22  ;;  %v688_v58 = vmul.f32 0.5, %v687_v52 }
 0x3a4   :  { %1619 = vtanh.f32 %v688_v58 }
 0x3b1   :  { %v1620_v59 = vpop.eup %1619 }
 0x3b2   :  { %v690_v61 = vmul.f32 0.5, %v1620_v59 }
 0x3b4   :  { %v691_v62 = vadd.f32 0.5, %v690_v61 }
 0x3b6   :  { %v708_v10 = vsub.f32 1.0, %v691_v62  ;;  %v714_v11 = vmul.f32 %v691_v62, %v1862_v30 }
 0x414   :  { %v699_v63 = vpop.permute.xlu1 %698 }
 0x415   :  { %v701_v2 = vmul.f32 %v699_v63, %v691_v62 }
 0x417   :  { %703 = vrot.lane.b32.xlu0 %v701_v2, %s1651_s22 }
 0x489   :  { %v704_v4 = vpop.permute.xlu0 %703 }
 0x48a   :  { %v706_v6 = vadd.f32 %v704_v4, %v579_v51 }
 0x48c   :  { %1621 = vtanh.f32 %v706_v6  ;;  %v366_v6 = vadd.f32 %v1896_v44, %v1803_v56 }
 0x499   :  { %v1622_v7 = vpop.eup %1621 }
 0x49a   :  { %710 = vrot.lane.b32.xlu1 %v1622_v7, %s1652_s25 }
 0x49e   :  { %391 = vperm.xlu1 %1613, %v1672_v1  }
 0x50c   :  { %v711_v0 = vpop.permute.xlu1 %710 }
 0x50d   :  { %v713_v14 = vmul.f32 %v711_v0, %v708_v10  ;;  %v381_v0 = vadd.f32 %v1898_v45, %v1805_v57 }
 0x50f   :  { %v1912_v15 = vadd.f32 %v714_v11, %v713_v14 }
 0x511   :  { %718 = vrot.lane.b32.xlu0 %v1912_v15, %s1652_s25 }
 0x515   :  { %394 = vperm.xlu0 %1614, %v1681_v3  }
 0x519   :  { %v392_v16 = vpop.permute.xlu1 %391 }
 0x51a   :  { %vm410_vm5 = vcmp.eq.s32.totalorder %v392_v16, %v1745_v22 }
 0x51b   :  { %v1367_v17 = vsel %vm410_vm5, 1.0, %v1649_v19 }
 0x51c   :  { %1512 = vmatprep.mubr.msk.f32.mxu0 %vm125_vm0, %v1367_v17 }
 0x583   :  { %v719_v1 = vpop.permute.xlu0 %718 }
 0x584   :  { %1541 = vmatmul.mubr.msk.f32.vlgmr.msra.gmra.mxu1 %vm125_vm0, %v719_v1 }
 0x585   :  { %1555 = vmatpush3.msra.mxu1 %v1827_v24  ;;  %1562 = vmatprep.mubr.msk.f32.mxu1 %vm1653_vm4, %v1649_v19 }
 0x586   :  { %1556 = vmatprep.subr.mxu1 %v1649_v19 }
 0x587   :  { %1557 = vmatpush3.msra.mxu1 %v1832_v25 }
 0x588   :  { %1558 = vmatprep.subr.mxu1 %v1649_v19 }
 0x589   :  { %1559 = vmatpush3.msra.mxu1 %v1840_v26 }
 0x58a   :  { %1560 = vmatprep.subr.mxu1 %v1649_v19 }
 0x58b   :  { %1561 = vmatpush3.msra.mxu1 %v1849_v27 }
 0x58c   :  { %1576 = vmatprep.subr.mxu1 %v1649_v19 }
 0x590   :  { %v395_v3 = vpop.permute.xlu0 %394 }
 0x591   :  { %vm411_vm6 = vcmp.eq.s32.totalorder %v395_v3, %v1745_v22 }
 0x592   :  { %v1368_v18 = vsel %vm411_vm6, 1.0, %v1649_v19 }
 0x593   :  { %1513 = vmatmul.mubr.msk.f32.gmra.mxu0 %vm125_vm0, %v1368_v18 }
 0x644   :  { %v788_v21 = vpop.f32.mrf.mxu1 }
 0x645   :  { %v797_v23 = vadd.f32 %v788_v21, %v1902_v47 }
 0x646   :  { %v1542_v28 = vpop.f32.mrf.mxu1 }
 0x647   :  { %799 = vrot.lane.b32.xlu1 %v797_v23, %s1651_s22 }
 0x653   :  { %v1514_v20 = vpop.f32.mrf.mxu0 }
 0x654   :  { %v1937_v31 = vadd.f32 %v1514_v20, %v361_v29 }
 0x655   :  { %v536_v32 = vpop.f32.mrf.mxu0 }
 0x656   :  { %v567_v34 = vadd.f32 %v536_v32, %v356_v33  ;;  %v581_v56 = vadd.f32 %v1814_v5, %v1937_v31 }
 0x658   :  { %v580_v35 = vadd.f32 %v1814_v5, %v567_v34 }
 0x65a   :  { %v792_v36 = vadd.f32 %v788_v21, %v580_v35 }
 0x65c   :  { %v793_v37 = vmul.f32 0.5, %v792_v36 }
 0x65e   :  { %1623 = vtanh.f32 %v793_v37 }
 0x66b   :  { %v1624_v38 = vpop.eup %1623 }
 0x66c   :  { %v795_v39 = vmul.f32 0.5, %v1624_v38 }
 0x66e   :  { %v796_v40 = vadd.f32 0.5, %v795_v39 }
 0x6b9   :  { %v800_v48 = vpop.permute.xlu1 %799 }
 0x6ba   :  { %v802_v49 = vmul.f32 %v800_v48, %v796_v40 }
 0x6bc   :  { %804 = vrot.lane.b32.xlu1 %v802_v49, %s1651_s22 }
 0x6c0   :  { %397 = vperm.xlu1 %1613, %v1704_v9   ;;  %v809_v9 = vsub.f32 1.0, %v796_v40 }
 0x6c4   :  { %403 = vperm.xlu1 %1613, %v1722_v13   ;;  %v815_v13 = vmul.f32 %v796_v40, %v1912_v15 }
 0x72e   :  { %v805_v53 = vpop.permute.xlu1 %804 }
 0x72f   :  { %v807_v41 = vadd.f32 %v805_v53, %v580_v35 }
 0x731   :  { %1625 = vtanh.f32 %v807_v41 }
 0x73b   :  { %v398_v54 = vpop.permute.xlu1 %397 }
 0x73c   :  { %vm412_vm7 = vcmp.eq.s32.totalorder %v398_v54, %v1745_v22 }
 0x73d   :  { %v1369_v42 = vsel %vm412_vm7, 1.0, %v1649_v19 }
 0x73e   :  { %v1626_v50 = vpop.eup %1625  ;;  %1515 = vmatprep.mubr.msk.f32.mxu0 %vm125_vm0, %v1369_v42 }
 0x73f   :  { %811 = vrot.lane.b32.xlu0 %v1626_v50, %s1652_s25  ;;  %v404_v59 = vpop.permute.xlu1 %403 }
 0x740   :  { %vm414_vm8 = vcmp.eq.s32.totalorder %v404_v59, %v1745_v22 }
 0x743   :  { %400 = vperm.xlu0 %1614, %v1699_v8  }
 0x747   :  { %406 = vperm.xlu0 %1614, %v1717_v12   ;;  %v1371_v12 = vsel %vm414_vm8, 1.0, %v1649_v19 }
 0x7b1   :  { %v812_v51 = vpop.permute.xlu0 %811 }
 0x7b2   :  { %v814_v52 = vmul.f32 %v812_v51, %v809_v9 }
 0x7b4   :  { %v1951_v58 = vadd.f32 %v815_v13, %v814_v52 }
 0x7b6   :  { %819 = vrot.lane.b32.xlu1 %v1951_v58, %s1652_s25 }
 0x7be   :  { %v401_v61 = vpop.permute.xlu0 %400 }
 0x7bf   :  { %vm413_vm9 = vcmp.eq.s32.totalorder %v401_v61, %v1745_v22 }
 0x7c0   :  { %v1370_v8 = vsel %vm413_vm9, 1.0, %v1649_v19 }
 0x7c1   :  { %1516 = vmatmul.mubr.msk.f32.gmra.mxu0 %vm125_vm0, %v1370_v8 }
 0x7c2   :  { %v407_v62 = vpop.permute.xlu0 %406  ;;  %1518 = vmatprep.mubr.msk.f32.mxu0 %vm125_vm0, %v1371_v12 }
 0x7c3   :  { %vm415_vm10 = vcmp.eq.s32.totalorder %v407_v62, %v1745_v22  ;;  %v371_v22 = vadd.f32 %v1894_v43, %v1801_v55 }
 0x7c4   :  { %v1372_v63 = vsel %vm415_vm10, 1.0, %v1649_v19 }
 0x7c5   :  { %1519 = vmatmul.mubr.msk.f32.gmra.mxu0 %vm125_vm0, %v1372_v63 }
 0x7c6   :  { %1551 = vmatprep.mubr.msk.f32.mxu0 %vm1653_vm4, %v1649_v19 }
 0x828   :  { %v820_v2 = vpop.permute.xlu1 %819 }
 0x829   :  { %1552 = vmatmul.mubr.msk.f32.vlgmr.msra.gmra.mxu0 %vm125_vm0, %v820_v2 }
 0x82a   :  { %1566 = vmatpush3.msra.mxu0 %v1827_v24  ;;  %1573 = vmatprep.mubr.msk.f32.mxu0 %vm1653_vm4, %v1649_v19 }
 0x82b   :  { %1567 = vmatprep.subr.mxu0 %v1649_v19 }
 0x82c   :  { %1568 = vmatpush3.msra.mxu0 %v1832_v25 }
 0x82d   :  { %1569 = vmatprep.subr.mxu0 %v1649_v19 }
 0x82e   :  { %1570 = vmatpush3.msra.mxu0 %v1840_v26 }
 0x82f   :  { %1571 = vmatprep.subr.mxu0 %v1649_v19 }
 0x830   :  { %1572 = vmatpush3.msra.mxu0 %v1849_v27 }
 0x831   :  { %1587 = vmatprep.subr.mxu0 %v1649_v19 }
 0x881   :  { %v1517_v4 = vpop.f32.mrf.mxu0 }
 0x882   :  { %v1981_v7 = vadd.f32 %v1517_v4, %v371_v22 }
 0x883   :  { %v546_v10 = vpop.f32.mrf.mxu0 }
 0x884   :  { %v569_v11 = vadd.f32 %v546_v10, %v366_v6 }
 0x885   :  { %v1520_v14 = vpop.f32.mrf.mxu0 }
 0x886   :  { %v1985_v16 = vadd.f32 %v1520_v14, %v381_v0  ;;  %v582_v40 = vadd.f32 %v1814_v5, %v569_v11 }
 0x887   :  { %v1987_v17 = vpop.f32.mrf.mxu0 }
 0x8e9   :  { %v889_v1 = vpop.f32.mrf.mxu0 }
 0x8ea   :  { %v898_v3 = vadd.f32 %v889_v1, %v1902_v47  ;;  %v893_v43 = vadd.f32 %v889_v1, %v581_v56 }
 0x8eb   :  { %v1553_v55 = vpop.f32.mrf.mxu0 }
 0x8ec   :  { %900 = vrot.lane.b32.xlu0 %v898_v3, %s1651_s22  ;;  %v894_v44 = vmul.f32 0.5, %v893_v43 }
 0x8ee   :  { %1627 = vtanh.f32 %v894_v44 }
 0x8fb   :  { %v1628_v18 = vpop.eup %1627 }
 0x8fc   :  { %v896_v57 = vmul.f32 0.5, %v1628_v18 }
 0x8fe   :  { %v897_v45 = vadd.f32 0.5, %v896_v57 }
 0x900   :  { %v910_v32 = vsub.f32 1.0, %v897_v45  ;;  %v916_v31 = vmul.f32 %v897_v45, %v1951_v58 }
 0x95e   :  { %v901_v21 = vpop.permute.xlu0 %900 }
 0x95f   :  { %v903_v23 = vmul.f32 %v901_v21, %v897_v45  ;;  %v376_v45 = vadd.f32 %v1900_v46, %v1807_v60 }
 0x961   :  { %905 = vrot.lane.b32.xlu1 %v903_v23, %s1651_s22  ;;  %v571_v21 = vadd.f32 %v1987_v17, %v376_v45 }
 0x963   :  { %v584_v23 = vadd.f32 %v1814_v5, %v571_v21 }
 0x9d3   :  { %v906_v28 = vpop.permute.xlu1 %905 }
 0x9d4   :  { %v908_v29 = vadd.f32 %v906_v28, %v581_v56 }
 0x9d6   :  { %1629 = vtanh.f32 %v908_v29 }
 0x9e3   :  { %v1630_v20 = vpop.eup %1629 }
 0x9e4   :  { %912 = vrot.lane.b32.xlu0 %v1630_v20, %s1652_s25 }
 0xa56   :  { %v913_v33 = vpop.permute.xlu0 %912 }
 0xa57   :  { %v915_v34 = vmul.f32 %v913_v33, %v910_v32 }
 0xa59   :  { %v1996_v35 = vadd.f32 %v916_v31, %v915_v34 }
 0xa5b   :  { %920 = vrot.lane.b32.xlu1 %v1996_v35, %s1652_s25 }
 0xacd   :  { %v921_v36 = vpop.permute.xlu1 %920 }
 0xace   :  { %1563 = vmatmul.mubr.msk.f32.vlgmr.msra.gmra.mxu1 %vm125_vm0, %v921_v36 }
 0xacf   :  { %1577 = vmatpush3.msra.mxu1 %v1827_v24  ;;  %1584 = vmatprep.mubr.msk.f32.mxu1 %vm1653_vm4, %v1649_v19 }
 0xad0   :  { %1578 = vmatprep.subr.mxu1 %v1649_v19 }
 0xad1   :  { %1579 = vmatpush3.msra.mxu1 %v1832_v25 }
 0xad2   :  { %1580 = vmatprep.subr.mxu1 %v1649_v19 }
 0xad3   :  { %1581 = vmatpush3.msra.mxu1 %v1840_v26 }
 0xad4   :  { %1582 = vmatprep.subr.mxu1 %v1649_v19 }
 0xad5   :  { %1583 = vmatpush3.msra.mxu1 %v1849_v27 }
 0xb8e   :  { %v990_v37 = vpop.f32.mrf.mxu1 }
 0xb8f   :  { %v999_v38 = vadd.f32 %v990_v37, %v1902_v47  ;;  %v994_v48 = vadd.f32 %v990_v37, %v582_v40 }
 0xb90   :  { %v1564_v39 = vpop.f32.mrf.mxu1 }
 0xb91   :  { %1001 = vrot.lane.b32.xlu0 %v999_v38, %s1651_s22  ;;  %v995_v49 = vmul.f32 0.5, %v994_v48 }
 0xb93   :  { %1631 = vtanh.f32 %v995_v49 }
 0xba0   :  { %v1632_v53 = vpop.eup %1631 }
 0xba1   :  { %v997_v41 = vmul.f32 0.5, %v1632_v53 }
 0xba3   :  { %v998_v54 = vadd.f32 0.5, %v997_v41 }
 0xba5   :  { %v1011_v52 = vsub.f32 1.0, %v998_v54  ;;  %v1017_v61 = vmul.f32 %v998_v54, %v1996_v35 }
 0xc03   :  { %v1002_v42 = vpop.permute.xlu0 %1001 }
 0xc04   :  { %v1004_v50 = vmul.f32 %v1002_v42, %v998_v54  ;;  %v585_v54 = vadd.f32 %v1814_v5, %v1985_v16 }
 0xc06   :  { %1006 = vrot.lane.b32.xlu1 %v1004_v50, %s1651_s22 }
 0xc78   :  { %v1007_v9 = vpop.permute.xlu1 %1006 }
 0xc79   :  { %v1009_v51 = vadd.f32 %v1007_v9, %v582_v40 }
 0xc7b   :  { %1633 = vtanh.f32 %v1009_v51 }
 0xc88   :  { %v1634_v13 = vpop.eup %1633 }
 0xc89   :  { %1013 = vrot.lane.b32.xlu0 %v1634_v13, %s1652_s25 }
 0xcfb   :  { %v1014_v59 = vpop.permute.xlu0 %1013 }
 0xcfc   :  { %v1016_v8 = vmul.f32 %v1014_v59, %v1011_v52 }
 0xcfe   :  { %v2016_v12 = vadd.f32 %v1017_v61, %v1016_v8 }
 0xd00   :  { %1021 = vrot.lane.b32.xlu1 %v2016_v12, %s1652_s25 }
 0xd72   :  { %v1022_v62 = vpop.permute.xlu1 %1021 }
 0xd73   :  { %1574 = vmatmul.mubr.msk.f32.vlgmr.msra.gmra.mxu0 %vm125_vm0, %v1022_v62  ;;  %v716_v62 = vadd.f32 %v1912_v15, %v1862_v30 }
 0xd74   :  { %1588 = vmatpush3.msra.mxu0 %v1827_v24  ;;  %1595 = vmatprep.mubr.msk.f32.mxu0 %vm1653_vm4, %v1649_v19  ;;  %v583_v24 = vadd.f32 %v1814_v5, %v1981_v7 }
 0xd75   :  { %1589 = vmatprep.subr.mxu0 %v1649_v19  ;;  %v817_v5 = vadd.f32 %v1951_v58, %v716_v62 }
 0xd76   :  { %1590 = vmatpush3.msra.mxu0 %v1832_v25 }
 0xd77   :  { %1591 = vmatprep.subr.mxu0 %v1649_v19  ;;  %v918_v16 = vadd.f32 %v1996_v35, %v817_v5 }
 0xd78   :  { %1592 = vmatpush3.msra.mxu0 %v1840_v26 }
 0xd79   :  { %1593 = vmatprep.subr.mxu0 %v1649_v19 }
 0xd7a   :  { %1594 = vmatpush3.msra.mxu0 %v1849_v27 }
 0xe33   :  { %v1091_v63 = vpop.f32.mrf.mxu0 }
 0xe34   :  { %v1100_v2 = vadd.f32 %v1091_v63, %v1902_v47  ;;  %v1095_v4 = vadd.f32 %v1091_v63, %v583_v24  ;;  %v1019_v63 = vadd.f32 %v2016_v12, %v918_v16 }
 0xe35   :  { %v1575_v22 = vpop.f32.mrf.mxu0 }
 0xe36   :  { %1102 = vrot.lane.b32.xlu0 %v1100_v2, %s1651_s22  ;;  %v1096_v6 = vmul.f32 0.5, %v1095_v4 }
 0xe38   :  { %1635 = vtanh.f32 %v1096_v6 }
 0xe45   :  { %v1636_v25 = vpop.eup %1635 }
 0xe46   :  { %v1098_v10 = vmul.f32 0.5, %v1636_v25 }
 0xe48   :  { %v1099_v0 = vadd.f32 0.5, %v1098_v10 }
 0xe4a   :  { %v1112_v1 = vsub.f32 1.0, %v1099_v0  ;;  %v1118_v7 = vmul.f32 %v1099_v0, %v2016_v12 }
 0xea8   :  { %v1103_v26 = vpop.permute.xlu0 %1102 }
 0xea9   :  { %v1105_v11 = vmul.f32 %v1103_v26, %v1099_v0 }
 0xeab   :  { %1107 = vrot.lane.b32.xlu1 %v1105_v11, %s1651_s22 }
 0xf1d   :  { %v1108_v19 = vpop.permute.xlu1 %1107 }
 0xf1e   :  { %v1110_v27 = vadd.f32 %v1108_v19, %v583_v24 }
 0xf20   :  { %1637 = vtanh.f32 %v1110_v27 }
 0xf2d   :  { %v1638_v14 = vpop.eup %1637 }
 0xf2e   :  { %1114 = vrot.lane.b32.xlu0 %v1638_v14, %s1652_s25 }
 0xfa0   :  { %v1115_v3 = vpop.permute.xlu0 %1114 }
 0xfa1   :  { %v1117_v55 = vmul.f32 %v1115_v3, %v1112_v1 }
 0xfa3   :  { %v1119_v56 = vadd.f32 %v1118_v7, %v1117_v55 }
 0xfa5   :  { %1122 = vrot.lane.b32.xlu1 %v1119_v56, %s1652_s25  ;;  %v1120_v24 = vadd.f32 %v1119_v56, %v1019_v63 }
0x1017   :  { %v1123_v43 = vpop.permute.xlu1 %1122 }
0x1018   :  { %1585 = vmatmul.mubr.msk.f32.vlgmr.msra.gmra.mxu1 %vm125_vm0, %v1123_v43 }
0x10d8   :  { %v1192_v44 = vpop.f32.mrf.mxu1 }
0x10d9   :  { %v1201_v18 = vadd.f32 %v1192_v44, %v1902_v47  ;;  %v1196_v28 = vadd.f32 %v1192_v44, %v584_v23 }
0x10da   :  { %v1586_v57 = vpop.f32.mrf.mxu1 }
0x10db   :  { %1203 = vrot.lane.b32.xlu0 %v1201_v18, %s1651_s22  ;;  %v1197_v29 = vmul.f32 0.5, %v1196_v28 }
0x10dd   :  { %1639 = vtanh.f32 %v1197_v29 }
0x10ea   :  { %v1640_v20 = vpop.eup %1639 }
0x10eb   :  { %v1199_v32 = vmul.f32 0.5, %v1640_v20 }
0x10ed   :  { %v1200_v33 = vadd.f32 0.5, %v1199_v32 }
0x10ef   :  { %v1213_v60 = vsub.f32 1.0, %v1200_v33  ;;  %v1219_v17 = vmul.f32 %v1200_v33, %v1119_v56 }
0x114d   :  { %v1204_v31 = vpop.permute.xlu0 %1203 }
0x114e   :  { %v1206_v34 = vmul.f32 %v1204_v31, %v1200_v33 }
0x1150   :  { %1208 = vrot.lane.b32.xlu1 %v1206_v34, %s1651_s22 }
0x11c2   :  { %v1209_v36 = vpop.permute.xlu1 %1208 }
0x11c3   :  { %v1211_v37 = vadd.f32 %v1209_v36, %v584_v23 }
0x11c5   :  { %1641 = vtanh.f32 %v1211_v37 }
0x11d2   :  { %v1642_v38 = vpop.eup %1641 }
0x11d3   :  { %1215 = vrot.lane.b32.xlu0 %v1642_v38, %s1652_s25 }
0x1245   :  { %v1216_v46 = vpop.permute.xlu0 %1215 }
0x1246   :  { %v1218_v39 = vmul.f32 %v1216_v46, %v1213_v60 }
0x1248   :  { %v1220_v40 = vadd.f32 %v1219_v17, %v1218_v39 }
0x124a   :  { %1223 = vrot.lane.b32.xlu1 %v1220_v40, %s1652_s25  ;;  %v1221_v10 = vadd.f32 %v1220_v40, %v1120_v24 }
0x12bc   :  { %v1224_v48 = vpop.permute.xlu1 %1223 }
0x12bd   :  { %1596 = vmatmul.mubr.msk.f32.vlgmr.msra.gmra.mxu0 %vm125_vm0, %v1224_v48 }
0x137d   :  { %v1293_v49 = vpop.f32.mrf.mxu0 }
0x137e   :  { %v1302_v53 = vadd.f32 %v1293_v49, %v1902_v47  ;;  %v1297_v42 = vadd.f32 %v1293_v49, %v585_v54 }
0x137f   :  { %v1597_v41 = vpop.f32.mrf.mxu0 }
0x1380   :  { %1304 = vrot.lane.b32.xlu0 %v1302_v53, %s1651_s22  ;;  %v1298_v50 = vmul.f32 0.5, %v1297_v42 }
0x1382   :  { %1643 = vtanh.f32 %v1298_v50 }
0x138f   :  { %v1644_v9 = vpop.eup %1643 }
0x1390   :  { %v1300_v51 = vmul.f32 0.5, %v1644_v9 }
0x1392   :  { %v1301_v13 = vadd.f32 0.5, %v1300_v51 }
0x1394   :  { %v1314_v2 = vsub.f32 1.0, %v1301_v13  ;;  %v1320_v4 = vmul.f32 %v1301_v13, %v1220_v40 }
0x13f2   :  { %v1305_v52 = vpop.permute.xlu0 %1304 }
0x13f3   :  { %v1307_v59 = vmul.f32 %v1305_v52, %v1301_v13 }
0x13f5   :  { %1309 = vrot.lane.b32.xlu1 %v1307_v59, %s1651_s22 }
0x1467   :  { %v1310_v61 = vpop.permute.xlu1 %1309 }
0x1468   :  { %v1312_v8 = vadd.f32 %v1310_v61, %v585_v54 }
0x146a   :  { %1645 = vtanh.f32 %v1312_v8 }
0x1477   :  { %v1646_v47 = vpop.eup %1645 }
0x1478   :  { %1316 = vrot.lane.b32.xlu0 %v1646_v47, %s1652_s25 }
0x14ea   :  { %v1317_v22 = vpop.permute.xlu0 %1316 }
0x14eb   :  { %v1319_v6 = vmul.f32 %v1317_v22, %v1314_v2 }
0x14ed   :  { %v1321_v25 = vadd.f32 %v1320_v4, %v1319_v6 }
0x14ef   :  { %v1322_v0 = vadd.f32 %v1321_v25, %v1221_v10 }
0x14f1   :  { %v1323_v26 = vmul.f32 0.125, %v1322_v0 }
0x14f3   :  { %1325 = vrot.lane.b32.xlu1 %v1323_v26, %s1652_s25 }
0x1565   :  { %v1326_v11 = vpop.permute.xlu1 %1325 }
0x1566   :  { %1328 = vst.msk [vmem:[%s2067_s2] sm:$0xff] %vm125_vm0, %v1326_v11 }

</bundles_post_ra>
